<compile_context>
chip_gen: v7x
topology: tpu7x:2x2x1
jax: 0.10.0
libtpu: 0.0.40
codegen_flags: <defaults>
</compile_context>

<pallas_src>
import functools

import jax
import jax.numpy as jnp
from jax.experimental import pallas as pl
from jax.experimental.pallas import tpu as pltpu


def _inv_loss_kernel(x_ref, y_ref, o_ref, s1_ref, s2_ref, *, n_val, lamda, mask_cols):
    j = pl.program_id(1)  # spatial (reduction) axis, innermost

    # Reset per-row partial sums at the start of each row block's spatial loop.
    @pl.when(j == 0)
    def _():
        s1_ref[...] = jnp.zeros_like(s1_ref)
        s2_ref[...] = jnp.zeros_like(s2_ref)

    d = x_ref[...].astype(jnp.float32) - y_ref[...].astype(jnp.float32)

    # Mask the ragged spatial tail (static flag: only emitted when needed).
    if mask_cols:
        tile_n = x_ref.shape[1]
        col = j * tile_n + jax.lax.broadcasted_iota(jnp.int32, d.shape, 1)
        d = jnp.where(col < n_val, d, 0.0)

    # Keep intermediates 2-D (tile_rows, 1) for clean lane layouts.
    s1_ref[...] += jnp.sum(d, axis=1, keepdims=True)
    s2_ref[...] += jnp.sum(d * d, axis=1, keepdims=True)

    # Finalize per-row loss only after the full spatial reduction.
    @pl.when(j == pl.num_programs(1) - 1)
    def _():
        inv_n = 1.0 / float(n_val)
        s1 = s1_ref[...]
        s2 = s2_ref[...]
        o_ref[...] = s2 * inv_n - lamda * (s1 * s1) * (inv_n * inv_n)


def inv_loss(x, y, lamda=0.5):
    """Pallas implementation of InvLoss.forward for NCHW inputs."""
    assert x.shape == y.shape and x.ndim == 4
    B, C, H, W = x.shape
    n_val = H * W
    rows = B * C

    xf = x.reshape(rows, n_val)
    yf = y.reshape(rows, n_val)

    LANE = 128
    itemsize = jnp.dtype(x.dtype).itemsize
    # Native sublane packing: 8 for 4-byte, 16 for bf16, 32 for int8/fp8.
    sub = max(8, 32 // itemsize)

    # Per-generation VMEM budget (v7x: 64 MiB/TC; v5e/v6e: 128 MiB).
    try:
        vmem_cap = int(getattr(pltpu.get_tpu_info(), "vmem_capacity_bytes", 0))
    except Exception:
        vmem_cap = 0
    if vmem_cap >= 96 * 1024 * 1024:          # v5e / v6e
        block_budget = 48 * 1024 * 1024
        vmem_limit = 64 * 1024 * 1024
    else:                                     # v7x-class or unknown (conservative)
        block_budget = 32 * 1024 * 1024
        vmem_limit = 44 * 1024 * 1024

    # Per-element VMEM cost: 2 inputs x 2 pipeline buffers (native dtype)
    # + ~3 full-block f32 temporaries (d, d*d, upcasts).
    per_elem = 4 * itemsize + 12
    max_block_elems = max(sub * LANE, block_budget // per_elem)

    # Spatial (reduction) tile: full extent when it fits, lane-granular.
    if n_val <= LANE:
        tile_n = n_val  # full-dim block is always legal
    else:
        n128 = pl.cdiv(n_val, LANE) * LANE
        cap_n = max(LANE, (max_block_elems // sub) // LANE * LANE)
        tile_n = min(n128, cap_n)

    # Row tile: fill the element budget, sublane-granular; clamp so the
    # "parallel" row axis has >= 2 blocks whenever possible (v7x megacore).
    tile_rows = max(sub, (max_block_elems // tile_n) // sub * sub)
    tile_rows = min(tile_rows, pl.cdiv(rows, sub) * sub)
    if rows >= 2 * sub:
        half_rows = pl.cdiv(pl.cdiv(rows, 2), sub) * sub
        tile_rows = min(tile_rows, half_rows)

    grid = (pl.cdiv(rows, tile_rows), pl.cdiv(n_val, tile_n))
    mask_cols = (n_val % tile_n) != 0  # only the ragged tail needs masking

    kernel = functools.partial(
        _inv_loss_kernel, n_val=n_val, lamda=float(lamda), mask_cols=mask_cols
    )

    per_row = pl.pallas_call(
        kernel,
        out_shape=jax.ShapeDtypeStruct((rows, 1), jnp.float32),
        grid_spec=pltpu.PrefetchScalarGridSpec(
            num_scalar_prefetch=0,
            grid=grid,
            in_specs=[
                pl.BlockSpec((tile_rows, tile_n), lambda i, j: (i, j)),
                pl.BlockSpec((tile_rows, tile_n), lambda i, j: (i, j)),
            ],
            # Per-row-block output, resident across the spatial axis.
            out_specs=pl.BlockSpec((tile_rows, 1), lambda i, j: (i, 0)),
            scratch_shapes=[
                pltpu.VMEM((tile_rows, 1), jnp.float32),  # s1 partials
                pltpu.VMEM((tile_rows, 1), jnp.float32),  # s2 partials
            ],
        ),
        compiler_params=pltpu.CompilerParams(
            # Row blocks are independent -> parallel (megacore on v7x);
            # spatial reduction axis must stay arbitrary.
            dimension_semantics=("parallel", "arbitrary"),
            vmem_limit_bytes=vmem_limit,
        ),
    )(xf, yf)

    # Final tree reduction outside the kernel.
    return jnp.sum(per_row)


def inv_loss_ref(x, y, lamda=0.5):
    """Pure-JAX reference mirroring the PyTorch module."""
    d = x.astype(jnp.float32) - y.astype(jnp.float32)
    n_val = x.shape[2] * x.shape[3]
    mse = jnp.sum(d * d, axis=(2, 3)) / n_val
    ds = jnp.sum(d, axis=(2, 3))
    mss = -lamda * (ds * ds) / (n_val ** 2)
    return jnp.sum(mse + mss)


if __name__ == "__main__":
    key = jax.random.PRNGKey(0)
    k1, k2, k3, k4, k5, k6 = jax.random.split(key, 6)

    # Primary small test (tile-aligned shapes).
    B, C, H, W = 2, 4, 16, 16
    x = jax.random.normal(k1, (B, C, H, W), dtype=jnp.float32)
    y = jax.random.normal(k2, (B, C, H, W), dtype=jnp.float32)

    loss = inv_loss(x, y, lamda=0.5)
    jax.block_until_ready(loss)
    ref = inv_loss_ref(x, y, lamda=0.5)
    assert jnp.allclose(loss, ref, rtol=1e-5, atol=1e-5), (loss, ref)

    # Ragged test: rows and H*W not multiples of 8/128 (in-kernel masking +
    # partial edge blocks, no host-side padding).
    x2 = jax.random.normal(k3, (2, 3, 20, 20), dtype=jnp.float32)
    y2 = jax.random.normal(k4, (2, 3, 20, 20), dtype=jnp.float32)
    loss2 = inv_loss(x2, y2, lamda=0.5)
    jax.block_until_ready(loss2)
    ref2 = inv_loss_ref(x2, y2, lamda=0.5)
    assert jnp.allclose(loss2, ref2, rtol=1e-5, atol=1e-5), (loss2, ref2)

    # Ragged + multi-row-block test (exercises >=2 row blocks / megacore path).
    x3 = jax.random.normal(k5, (4, 5, 24, 24), dtype=jnp.float32)
    y3 = jax.random.normal(k6, (4, 5, 24, 24), dtype=jnp.float32)
    loss3 = inv_loss(x3, y3, lamda=0.5)
    jax.block_until_ready(loss3)
    ref3 = inv_loss_ref(x3, y3, lamda=0.5)
    assert jnp.allclose(loss3, ref3, rtol=1e-5, atol=1e-5), (loss3, ref3)

    print("KERNEL_OK")
</pallas_src>

<mosaic_0001>
module attributes {stable_mosaic.version = 11 : i64} {
  func.func @_inv_loss_kernel(%arg0: i32, %arg1: i32, %arg2: memref<8x256xf32, #tpu.memory_space<vmem>>, %arg3: memref<8x256xf32, #tpu.memory_space<vmem>>, %arg4: memref<8x1xf32, #tpu.memory_space<vmem>>, %arg5: memref<8x1xf32, #tpu.memory_space<vmem>>, %arg6: memref<8x1xf32, #tpu.memory_space<vmem>>) attributes {dimension_semantics = [#tpu.dimension_semantics<parallel>, #tpu.dimension_semantics<arbitrary>], iteration_bounds = array<i64: 1, 1>, scalar_prefetch = 0 : i64, scratch_operands = 2 : i64, tpu.core_type = #tpu.core_type<tc>, window_params = [{transform_indices = @transform_0, window_bounds = array<i64: 8, 256>}, {transform_indices = @transform_1, window_bounds = array<i64: 8, 256>}, {transform_indices = @transform_2, window_bounds = array<i64: 8, 1>}]} {
    %c0_i32 = arith.constant 0 : i32
    %0 = arith.cmpi eq, %arg1, %c0_i32 : i32
    %1 = arith.extui %0 : i1 to i32
    %c0_i32_0 = arith.constant 0 : i32
    %2 = arith.cmpi ne, %1, %c0_i32_0 : i32
    scf.if %2 {
      %cst_15 = arith.constant 0.000000e+00 : f32
      %20 = vector.broadcast %cst_15 : f32 to vector<8x1xf32>
      %c0_16 = arith.constant 0 : index
      %c0_17 = arith.constant 0 : index
      %21 = vector.load %arg5[%c0_16, %c0_17] : memref<8x1xf32, #tpu.memory_space<vmem>>, vector<8x1xf32>
      tpu.vector_store %arg5[%c0_16, %c0_17], %20 {strides = array<i32>} : memref<8x1xf32, #tpu.memory_space<vmem>>, vector<8x1xf32>,
      %cst_18 = arith.constant 0.000000e+00 : f32
      %22 = vector.broadcast %cst_18 : f32 to vector<8x1xf32>
      %c0_19 = arith.constant 0 : index
      %c0_20 = arith.constant 0 : index
      %23 = vector.load %arg6[%c0_19, %c0_20] : memref<8x1xf32, #tpu.memory_space<vmem>>, vector<8x1xf32>
      tpu.vector_store %arg6[%c0_19, %c0_20], %22 {strides = array<i32>} : memref<8x1xf32, #tpu.memory_space<vmem>>, vector<8x1xf32>,
    } else {
    }
    %c0 = arith.constant 0 : index
    %c0_1 = arith.constant 0 : index
    %3 = vector.load %arg2[%c0, %c0_1] : memref<8x256xf32, #tpu.memory_space<vmem>>, vector<8x256xf32>
    %c0_2 = arith.constant 0 : index
    %c0_3 = arith.constant 0 : index
    %4 = vector.load %arg3[%c0_2, %c0_3] : memref<8x256xf32, #tpu.memory_space<vmem>>, vector<8x256xf32>
    %5 = arith.subf %3, %4 : vector<8x256xf32>
    %c0_4 = arith.constant 0 : index
    %c0_5 = arith.constant 0 : index
    %6 = vector.load %arg5[%c0_4, %c0_5] : memref<8x1xf32, #tpu.memory_space<vmem>>, vector<8x1xf32>
    %cst = arith.constant dense<0.000000e+00> : vector<8xf32>
    %7 = vector.multi_reduction <add>, %5, %cst [1] : vector<8x256xf32> to vector<8xf32>
    %8 = vector.shape_cast %7 : vector<8xf32> to vector<8x1xf32>
    %9 = arith.addf %6, %8 : vector<8x1xf32>
    %c0_6 = arith.constant 0 : index
    %c0_7 = arith.constant 0 : index
    %10 = vector.load %arg5[%c0_6, %c0_7] : memref<8x1xf32, #tpu.memory_space<vmem>>, vector<8x1xf32>
    tpu.vector_store %arg5[%c0_6, %c0_7], %9 {strides = array<i32>} : memref<8x1xf32, #tpu.memory_space<vmem>>, vector<8x1xf32>,
    %c0_8 = arith.constant 0 : index
    %c0_9 = arith.constant 0 : index
    %11 = vector.load %arg6[%c0_8, %c0_9] : memref<8x1xf32, #tpu.memory_space<vmem>>, vector<8x1xf32>
    %12 = arith.mulf %5, %5 : vector<8x256xf32>
    %cst_10 = arith.constant dense<0.000000e+00> : vector<8xf32>
    %13 = vector.multi_reduction <add>, %12, %cst_10 [1] : vector<8x256xf32> to vector<8xf32>
    %14 = vector.shape_cast %13 : vector<8xf32> to vector<8x1xf32>
    %15 = arith.addf %11, %14 : vector<8x1xf32>
    %c0_11 = arith.constant 0 : index
    %c0_12 = arith.constant 0 : index
    %16 = vector.load %arg6[%c0_11, %c0_12] : memref<8x1xf32, #tpu.memory_space<vmem>>, vector<8x1xf32>
    tpu.vector_store %arg6[%c0_11, %c0_12], %15 {strides = array<i32>} : memref<8x1xf32, #tpu.memory_space<vmem>>, vector<8x1xf32>,
    %c0_i32_13 = arith.constant 0 : i32
    %17 = arith.cmpi eq, %arg1, %c0_i32_13 : i32
    %18 = arith.extui %17 : i1 to i32
    %c0_i32_14 = arith.constant 0 : i32
    %19 = arith.cmpi ne, %18, %c0_i32_14 : i32
    scf.if %19 {
      %c0_15 = arith.constant 0 : index
      %c0_16 = arith.constant 0 : index
      %20 = vector.load %arg5[%c0_15, %c0_16] : memref<8x1xf32, #tpu.memory_space<vmem>>, vector<8x1xf32>
      %c0_17 = arith.constant 0 : index
      %c0_18 = arith.constant 0 : index
      %21 = vector.load %arg6[%c0_17, %c0_18] : memref<8x1xf32, #tpu.memory_space<vmem>>, vector<8x1xf32>
      %cst_19 = arith.constant 3.906250e-03 : f32
      %22 = vector.broadcast %cst_19 : f32 to vector<8x1xf32>
      %23 = arith.mulf %21, %22 : vector<8x1xf32>
      %24 = arith.mulf %20, %20 : vector<8x1xf32>
      %cst_20 = arith.constant 5.000000e-01 : f32
      %25 = vector.broadcast %cst_20 : f32 to vector<8x1xf32>
      %26 = arith.mulf %25, %24 : vector<8x1xf32>
      %cst_21 = arith.constant 1.52587891E-5 : f32
      %27 = vector.broadcast %cst_21 : f32 to vector<8x1xf32>
      %28 = arith.mulf %26, %27 : vector<8x1xf32>
      %29 = arith.subf %23, %28 : vector<8x1xf32>
      %c0_22 = arith.constant 0 : index
      %c0_23 = arith.constant 0 : index
      %30 = vector.load %arg4[%c0_22, %c0_23] : memref<8x1xf32, #tpu.memory_space<vmem>>, vector<8x1xf32>
      tpu.vector_store %arg4[%c0_22, %c0_23], %29 {strides = array<i32>} : memref<8x1xf32, #tpu.memory_space<vmem>>, vector<8x1xf32>,
    } else {
    }
    return
  }
  func.func @transform_0(%arg0: i32, %arg1: i32) -> (i32, i32) {
    %c0_i32 = arith.constant 0 : i32
    return %arg0, %arg1 : i32, i32
  }
  func.func @transform_1(%arg0: i32, %arg1: i32) -> (i32, i32) {
    %c0_i32 = arith.constant 0 : i32
    return %arg0, %arg1 : i32, i32
  }
  func.func @transform_2(%arg0: i32, %arg1: i32) -> (i32, i32) {
    %c0_i32 = arith.constant 0 : i32
    %c0_i32_0 = arith.constant 0 : i32
    return %arg0, %c0_i32 : i32, i32
  }
}

</mosaic_0001>

<bundles_post_ra>
// kernel: tpu_custom_call.1
= control target key start
LH: loop header
LB: loop body
LE: loop exit
PB: predicated region body
PF: predicated region fallthrough
CT: control target
= control target key end

     0   :  { %7 = vsyncpa [#allocation5], 0  ;;  %s181_s0 = inlined_call_operand.hbm [shape: f32[8,256], index: 0, kind: input, shape index: {}]   ;;  %s182_s1 = inlined_call_operand.hbm [shape: f32[8,256], index: 1, kind: input, shape index: {}]   ;;  %s183_s2 = inlined_call_operand.vmem [shape: f32[8,1], index: 2, kind: output, shape index: {}]  }
   0x1   :  { %8 = vsyncpa [#allocation7], 0  ;;  %s131_s9 = smov [#allocation4]   ;;  %s132_s11 = smov [#allocation6]  }
   0x2   :  { %s15_s10 = sshll.u32 %s131_s9, 4  ;;  %s25_s12 = sshll.u32 %s132_s11, 4  ;;  %s16_s10 = int_to_ptr.vmem [resolvable:$true] %s15_s10  ;;  %s26_s12 = int_to_ptr.vmem [resolvable:$true] %s25_s12 }
   0x3   :  { %s83_s15 = scalar_lea.hbm %s181_s0, 256 }
   0x4   :  { %p84_p0 = scmp.ne.s32.totalorder %s181_s0, %s83_s15  ;;  %p87_p1 = scmp.lt.u32.totalorder %s83_s15, %s181_s0 }
   0x6   :  { %p89_p2 = pnand %p87_p1, %p84_p0 }
   0x8   :  { %92 = shalt.err (!%p89_p2)
}
   0x9   :  { %s93_s20 = scalar_lea.vmem %s16_s10, 256  ;;  %p98_p4 = scmp.lt.s32.totalorder %s16_s10, %s16_s10 }
   0xa   :  { %p94_p3 = scmp.ne.s32.totalorder %s16_s10, %s93_s20  ;;  %p99_p5 = scmp.lt.s32.totalorder %s93_s20, %s93_s20 }
   0xc   :  { %p100_p6 = por %p99_p5, %p98_p4 }
   0xe   :  { %p101_p7 = pnand %p100_p6, %p94_p3 }
  0x10   :  { %104 = shalt.err (!%p101_p7)
}
  0x11   :  { %18 = dma.hbm_to_vmem [thread:$0]  %s181_s0, 256, %s16_s10, [#allocation5]  }
  0x12   :  { %s105_s25 = scalar_lea.hbm %s182_s1, 256 }
  0x13   :  { %p106_p8 = scmp.ne.s32.totalorder %s182_s1, %s105_s25  ;;  %p109_p9 = scmp.lt.u32.totalorder %s105_s25, %s182_s1 }
  0x15   :  { %p111_p10 = pnand %p109_p9, %p106_p8 }
  0x17   :  { %114 = shalt.err (!%p111_p10)
}
  0x18   :  { %s115_s30 = scalar_lea.vmem %s26_s12, 256  ;;  %p120_p12 = scmp.lt.s32.totalorder %s26_s12, %s26_s12 }
  0x19   :  { %p116_p11 = scmp.ne.s32.totalorder %s26_s12, %s115_s30  ;;  %p121_p13 = scmp.lt.s32.totalorder %s115_s30, %s115_s30 }
  0x1b   :  { %p122_p0 = por %p121_p13, %p120_p12 }
  0x1d   :  { %p123_p1 = pnand %p122_p0, %p116_p11 }
  0x1f   :  { %126 = shalt.err (!%p123_p1)
}
  0x20   :  { %28 = dma.hbm_to_vmem [thread:$0]  %s182_s1, 256, %s26_s12, [#allocation7]  }
  0x21   :  { %127 = dma.done.wait [#allocation5], 256  }
  0x22   :  { %128 = vsyncadd [#allocation5], 4294967040 }
  0x23   :  { %129 = dma.done.wait [#allocation7], 256  }
  0x24   :  { %130 = vsyncadd [#allocation7], 4294967040  ;;  %vm39_vm0 = vcmask 7168   ;;  %v133_v0 = vmov 0.0   ;;  %v42_v1 = vld [vmem:[#allocation4] sm:$0xff]  ;;  %v43_v2 = vld [vmem:[#allocation4 + $0x8] sm:$0xff] }
  0x25   :  { %40 = vst.msk [vmem:[#allocation2] sm:$0xff] %vm39_vm0, %v133_v0  ;;  %41 = vst.msk [vmem:[#allocation3] sm:$0xff] %vm39_vm0, %v133_v0  ;;  %v44_v3 = vld [vmem:[#allocation6] sm:$0xff]  ;;  %v45_v4 = vld [vmem:[#allocation6 + $0x8] sm:$0xff] }
  0x26   :  { %v46_v5 = vsub.f32 %v42_v1, %v44_v3  ;;  %v47_v6 = vsub.f32 %v43_v2, %v45_v4 }
  0x28   :  { %v56_v7 = vmul.f32 %v46_v5, %v46_v5  ;;  %v49_v8 = vadd.f32 %v47_v6, %v46_v5  ;;  %v57_v9 = vmul.f32 %v47_v6, %v47_v6 }
  0x2a   :  { %50 = vadd.xlane.f32.xlu0 %v49_v8  ;;  %v58_v10 = vadd.f32 %v57_v9, %v56_v7 }
  0x2c   :  { %v48_v11 = vld [vmem:[#allocation2] sm:$0xff]  ;;  %v55_v14 = vld [vmem:[#allocation3] sm:$0xff] }
  0x2e   :  { %59 = vadd.xlane.f32.xlu0 %v58_v10 }
  0xb7   :  { %v51_v12 = vpop.xlane.xlu0 %50 }
  0xb8   :  { %v52_v13 = vadd.f32 %v51_v12, %v48_v11 }
  0xba   :  { %54 = vst.msk [vmem:[#allocation2] sm:$0xff] %vm39_vm0, %v52_v13 }
  0xbb   :  { %v60_v15 = vpop.xlane.xlu0 %59 }
  0xbc   :  { %v61_v16 = vadd.f32 %v60_v15, %v55_v14 }
  0xbe   :  { %62 = vst.msk [vmem:[#allocation3] sm:$0xff] %vm39_vm0, %v61_v16 }
  0xc1   :  { %v66_v17 = vld [vmem:[#allocation2] sm:$0xff] }
  0xc2   :  { %v69_v18 = vmul.f32 %v66_v17, %v66_v17 }
  0xc4   :  { %v70_v19 = vmul.f32 0.5, %v69_v18 }
  0xc5   :  { %v67_v20 = vld [vmem:[#allocation3] sm:$0xff] }
  0xc6   :  { %v71_v21 = vmul.f32 1.5258789e-05, %v70_v19  ;;  %v68_v22 = vmul.f32 0.00390625, %v67_v20 }
  0xc8   :  { %v72_v23 = vsub.f32 %v68_v22, %v71_v21 }
  0xca   :  { %73 = vst.msk [vmem:[%s183_s2] sm:$0xff] %vm39_vm0, %v72_v23 }
  0xcb   :  { %78 = vsyncpa [#allocation5], 1 }
  0xcc   :  { %79 = vsyncpa [#allocation7], 1 }

</bundles_post_ra>
